<compile_context>
chip_gen: v7x
topology: tpu7x:2x2x1
jax: 0.10.0
libtpu: 0.0.40
codegen_flags: <defaults>
</compile_context>

<pallas_src>
import math

import jax
import jax.numpy as jnp
from jax.experimental import pallas as pl
from jax.experimental.pallas import tpu as pltpu


def _self_attention_kernel(x_ref, w_ref, b_ref, ctx_ref, sc_ref):
    # x_ref:   (TB, S, D) VMEM tile of input rows (native dtype, e.g. bf16/f32)
    # w_ref:   (1, D)     VMEM (full scorer weight, PyTorch Linear layout)
    # b_ref:   (1, 1)     SMEM scalar bias
    # ctx_ref: (TB, D)    output context tile
    # sc_ref:  (TB, S)    output softmax-scores tile
    x = x_ref[...]                                              # (TB, S, D) native dtype
    w = w_ref[...].astype(jnp.float32)                          # (1, D)
    bias = b_ref[0, 0]

    # Linear scorer on the VPU: broadcast multiply + lane reduction over the
    # feature dim, accumulating in f32.  The f32 product is a fused, short-
    # lived temporary; x itself is never re-materialized in f32.  Result is
    # already (TB, S) lane-major (scores layout).
    logits = jnp.sum(x.astype(jnp.float32) * w[None, :, :], axis=2) + bias   # (TB, S)

    # Numerically-stable softmax over the sequence axis.  Padded tail rows
    # (B % TB != 0) may hold garbage; their results are discarded on writeback.
    m = jnp.max(logits, axis=1, keepdims=True)                  # (TB, 1)
    e = jnp.exp(logits - m)                                     # (TB, S)
    denom = jnp.sum(e, axis=1, keepdims=True)                   # (TB, 1)
    # approx=True is a non-win here (operand is only (TB, 1)); keep the exact
    # form so results match the f32 reference to 1e-5.
    inv = pl.reciprocal(denom, approx=False)                    # (TB, 1)
    p = e * inv                                                 # (TB, S) normalized probs

    sc_ref[...] = p.astype(sc_ref.dtype)

    # Context via a batched MXU matmul: (TB,1,S) @ (TB,S,D) -> (TB,1,D), with
    # x in its native dtype (bf16 feeds the MXU directly, f32 accumulate).
    # TODO(synk): if a v7x bundle dump shows the degenerate M=1 matmul (per-row
    # RHS weight push) on the critical path, fall back to the VPU form
    # jnp.sum(p[:, :, None].astype(x.dtype) * x, axis=1).
    ctx = jnp.einsum(
        "bqs,bsd->bqd", p.astype(x.dtype)[:, None, :], x,
        preferred_element_type=jnp.float32)[:, 0, :]            # (TB, D)
    ctx_ref[...] = ctx.astype(ctx_ref.dtype)


def _pick_tile_batch(B, S, D, in_itemsize, out_itemsize,
                     target_block_bytes=2 * 1024 * 1024):
    """MiB-scale x block (>=85% of HBM roofline is reached at this size),
    capped to keep >= 8 grid steps (>= 4 per TensorCore on v7x), and aligned
    so the (TB, D)/(TB, S) output blocks satisfy the sublane rule."""
    if out_itemsize >= 4:
        align = 8
    elif out_itemsize == 2:
        align = 16
    else:
        align = 32
    row_bytes = max(1, S * D * in_itemsize)
    tb = max(1, target_block_bytes // row_bytes)
    if B >= 8 * align:
        tb = min(tb, B // 8)            # keep >= 8 grid steps (megacore + pipelining)
    tb = min(tb, B)
    if tb < B:
        tb = max(align, (tb // align) * align)
        if tb >= B:
            tb = B                      # block == full dim is always legal
    return int(tb)


def self_attention_forward(x, weight, bias, *, tile_batch=None,
                           vmem_limit_bytes=32 * 1024 * 1024,
                           buffer_count=None):
    """x: (B, S, D); weight: (1, D) (PyTorch Linear layout); bias: (1, 1).
    Returns (context (B, D), scores (B, S))."""
    B, S, D = x.shape
    out_dtype = x.dtype
    if tile_batch is None:
        tile_batch = _pick_tile_batch(
            B, S, D, x.dtype.itemsize, jnp.dtype(out_dtype).itemsize)
    grid = (pl.cdiv(B, tile_batch),)

    x_spec_kwargs = {}
    if buffer_count is not None:
        # Sweep knob: a third buffer can hide residual DMA latency with the
        # small-block policy; default (2) is used unless requested.
        x_spec_kwargs["pipeline_mode"] = pl.Buffered(buffer_count)

    grid_spec = pltpu.PrefetchScalarGridSpec(
        num_scalar_prefetch=0,
        grid=grid,
        in_specs=[
            pl.BlockSpec((tile_batch, S, D), lambda b: (b, 0, 0), **x_spec_kwargs),
            pl.BlockSpec((1, D), lambda b: (0, 0)),
            pl.BlockSpec((1, 1), lambda b: (0, 0), memory_space=pltpu.SMEM),
        ],
        out_specs=[
            pl.BlockSpec((tile_batch, D), lambda b: (b, 0)),
            pl.BlockSpec((tile_batch, S), lambda b: (b, 0)),
        ],
    )
    return pl.pallas_call(
        _self_attention_kernel,
        out_shape=(
            jax.ShapeDtypeStruct((B, D), out_dtype),
            jax.ShapeDtypeStruct((B, S), out_dtype),
        ),
        grid_spec=grid_spec,
        compiler_params=pltpu.CompilerParams(
            dimension_semantics=("parallel",),
            vmem_limit_bytes=int(vmem_limit_bytes),
        ),
    )(x, weight, bias)


def reference_forward(x, weight, bias):
    # Pure-JAX reference matching the PyTorch module (anchor=None, dropout=0).
    logits = jnp.einsum("bsd,d->bs", x, weight[0]) + bias[0, 0]   # (B, S)
    scores = jax.nn.softmax(logits, axis=1)
    context = jnp.einsum("bs,bsd->bd", scores, x)                 # (B, D)
    return context, scores


if __name__ == "__main__":
    # Small shapes consistent with the module: batch=2, seq=8, d_hid=32.
    B, S, D = 2, 8, 32
    key = jax.random.PRNGKey(0)
    kx, kw, kb = jax.random.split(key, 3)

    x = jax.random.normal(kx, (B, S, D), dtype=jnp.float32)

    # Deterministic init mirroring reset_parameters: U(-stdv, stdv), stdv=1/sqrt(d_hid)
    stdv = 1.0 / math.sqrt(D)
    weight = jax.random.uniform(kw, (1, D), minval=-stdv, maxval=stdv, dtype=jnp.float32)
    bias = jax.random.uniform(kb, (1, 1), minval=-stdv, maxval=stdv, dtype=jnp.float32)

    # TODO(synk): the anchor=True branch (concat with repeated anchor + extra
    # score `s`) is not exercised; only the default (anchor=None) path is implemented.

    context, scores = self_attention_forward(x, weight, bias)
    jax.block_until_ready((context, scores))

    ref_ctx, ref_sc = reference_forward(x, weight, bias)
    assert jnp.allclose(context, ref_ctx, atol=1e-5, rtol=1e-5), "context mismatch"
    assert jnp.allclose(scores, ref_sc, atol=1e-5, rtol=1e-5), "scores mismatch"

    print("KERNEL_OK")
</pallas_src>

<mosaic_0001>
module attributes {stable_mosaic.version = 11 : i64} {
  func.func @_self_attention_kernel(%arg0: i32, %arg1: memref<2x8x32xf32, #tpu.memory_space<vmem>>, %arg2: memref<1x32xf32, #tpu.memory_space<vmem>>, %arg3: memref<1x1xf32, #tpu.memory_space<smem>>, %arg4: memref<2x32xf32, #tpu.memory_space<vmem>>, %arg5: memref<2x8xf32, #tpu.memory_space<vmem>>) attributes {dimension_semantics = [#tpu.dimension_semantics<parallel>], iteration_bounds = array<i64: 1>, scalar_prefetch = 0 : i64, scratch_operands = 0 : i64, tpu.core_type = #tpu.core_type<tc>, window_params = [{transform_indices = @transform_0, window_bounds = array<i64: 2, 8, 32>}, {pipeline_mode = #tpu.pipeline_mode<synchronous>, transform_indices = @transform_1, window_bounds = array<i64: 1, 32>}, {transform_indices = @transform_2, window_bounds = array<i64: 1, 1>}, {transform_indices = @transform_3, window_bounds = array<i64: 2, 32>}, {transform_indices = @transform_4, window_bounds = array<i64: 2, 8>}]} {
    %c0 = arith.constant 0 : index
    %c0_0 = arith.constant 0 : index
    %c0_1 = arith.constant 0 : index
    %0 = vector.load %arg1[%c0, %c0_0, %c0_1] : memref<2x8x32xf32, #tpu.memory_space<vmem>>, vector<2x8x32xf32>
    %c0_2 = arith.constant 0 : index
    %c0_3 = arith.constant 0 : index
    %1 = vector.load %arg2[%c0_2, %c0_3] : memref<1x32xf32, #tpu.memory_space<vmem>>, vector<1x32xf32>
    %c0_4 = arith.constant 0 : index
    %c0_5 = arith.constant 0 : index
    %2 = memref.load %arg3[%c0_4, %c0_5] : memref<1x1xf32, #tpu.memory_space<smem>>
    %3 = vector.shape_cast %1 : vector<1x32xf32> to vector<1x1x32xf32>
    %4 = vector.broadcast %3 : vector<1x1x32xf32> to vector<2x8x32xf32>
    %5 = arith.mulf %0, %4 : vector<2x8x32xf32>
    %cst = arith.constant dense<0.000000e+00> : vector<2x8xf32>
    %6 = vector.multi_reduction <add>, %5, %cst [2] : vector<2x8x32xf32> to vector<2x8xf32>
    %7 = vector.broadcast %2 : f32 to vector<2x8xf32>
    %8 = arith.addf %6, %7 : vector<2x8xf32>
    %cst_6 = arith.constant dense<0xFF800000> : vector<2xf32>
    %9 = vector.multi_reduction <maximumf>, %8, %cst_6 [1] : vector<2x8xf32> to vector<2xf32>
    %10 = vector.shape_cast %9 : vector<2xf32> to vector<2x1xf32>
    %11 = vector.broadcast %10 : vector<2x1xf32> to vector<2x8xf32>
    %12 = arith.subf %8, %11 : vector<2x8xf32>
    %13 = math.exp %12 : vector<2x8xf32>
    %cst_7 = arith.constant dense<0.000000e+00> : vector<2xf32>
    %14 = vector.multi_reduction <add>, %13, %cst_7 [1] : vector<2x8xf32> to vector<2xf32>
    %15 = vector.shape_cast %14 : vector<2xf32> to vector<2x1xf32>
    %16 = tpu.reciprocal %15 : vector<2x1xf32> -> vector<2x1xf32>
    %17 = vector.broadcast %16 : vector<2x1xf32> to vector<2x8xf32>
    %18 = arith.mulf %13, %17 : vector<2x8xf32>
    %c0_8 = arith.constant 0 : index
    %c0_9 = arith.constant 0 : index
    %19 = vector.load %arg5[%c0_8, %c0_9] : memref<2x8xf32, #tpu.memory_space<vmem>>, vector<2x8xf32>
    tpu.vector_store %arg5[%c0_8, %c0_9], %18 {strides = array<i32>} : memref<2x8xf32, #tpu.memory_space<vmem>>, vector<2x8xf32>,
    %20 = vector.shape_cast %18 : vector<2x8xf32> to vector<2x1x8xf32>
    "tpu.trace_start"() <{level = 10 : i32, message = "bqs,bsd->bqd"}> : () -> ()
    %cst_10 = arith.constant dense<0.000000e+00> : vector<2x1x32xf32>
    %21 = tpu.matmul %20, %0, %cst_10 {dimension_numbers = #tpu.dot_dimension_numbers<[2], [1], [1], [2], [0, 0, 0, 1, 1, 2], [0], [0]>} : vector<2x1x8xf32>, vector<2x8x32xf32>, vector<2x1x32xf32> -> vector<2x1x32xf32>
    "tpu.trace_stop"() : () -> ()
    %22 = vector.shape_cast %21 : vector<2x1x32xf32> to vector<2x32xf32>
    %c0_11 = arith.constant 0 : index
    %c0_12 = arith.constant 0 : index
    %23 = vector.load %arg4[%c0_11, %c0_12] : memref<2x32xf32, #tpu.memory_space<vmem>>, vector<2x32xf32>
    tpu.vector_store %arg4[%c0_11, %c0_12], %22 {strides = array<i32>} : memref<2x32xf32, #tpu.memory_space<vmem>>, vector<2x32xf32>,
    return
  }
  func.func @transform_0(%arg0: i32) -> (i32, i32, i32) {
    %c0_i32 = arith.constant 0 : i32
    %c0_i32_0 = arith.constant 0 : i32
    %c0_i32_1 = arith.constant 0 : i32
    return %arg0, %c0_i32, %c0_i32_0 : i32, i32, i32
  }
  func.func @transform_1(%arg0: i32) -> (i32, i32) {
    %c0_i32 = arith.constant 0 : i32
    %c0_i32_0 = arith.constant 0 : i32
    %c0_i32_1 = arith.constant 0 : i32
    return %c0_i32, %c0_i32_0 : i32, i32
  }
  func.func @transform_2(%arg0: i32) -> (i32, i32) {
    %c0_i32 = arith.constant 0 : i32
    %c0_i32_0 = arith.constant 0 : i32
    %c0_i32_1 = arith.constant 0 : i32
    return %c0_i32, %c0_i32_0 : i32, i32
  }
  func.func @transform_3(%arg0: i32) -> (i32, i32) {
    %c0_i32 = arith.constant 0 : i32
    %c0_i32_0 = arith.constant 0 : i32
    return %arg0, %c0_i32 : i32, i32
  }
  func.func @transform_4(%arg0: i32) -> (i32, i32) {
    %c0_i32 = arith.constant 0 : i32
    %c0_i32_0 = arith.constant 0 : i32
    return %arg0, %c0_i32 : i32, i32
  }
}

</mosaic_0001>

<bundles_post_ra>
// kernel: tpu_custom_call.1
= control target key start
LH: loop header
LB: loop body
LE: loop exit
PB: predicated region body
PF: predicated region fallthrough
CT: control target
= control target key end

     0   :  { %11 = vsyncpa [#allocation4], 0  ;;  %s517_s0 = inlined_call_operand.hbm [shape: f32[2,8,32], index: 0, kind: input, shape index: {}]   ;;  %s518_s1 = inlined_call_operand.vmem [shape: f32[1,32], index: 1, kind: input, shape index: {}]   ;;  %s519_s2 = inlined_call_operand.<no memory space> [shape: f32[1,1], index: 2, kind: input, shape index: {}]   ;;  %s520_s3 = inlined_call_operand.hbm [shape: f32[2,32], index: 3, kind: output, shape index: {0}]   ;;  %s521_s4 = inlined_call_operand.hbm [shape: f32[2,8], index: 4, kind: output, shape index: {1}]  }
   0x1   :  { %12 = vsyncpa [#allocation5], 0 }
   0x2   :  { %13 = vsyncpa [#allocation8], 0  ;;  %s431_s15 = smov [#allocation3]   ;;  %s359_s19 = scalar_lea.hbm %s517_s0, 256 }
   0x3   :  { %s19_s16 = sshll.u32 %s431_s15, 4  ;;  %p360_p0 = scmp.ne.s32.totalorder %s517_s0, %s359_s19  ;;  %s20_s16 = int_to_ptr.vmem [resolvable:$true] %s19_s16 }
   0x4   :  { %p363_p1 = scmp.lt.u32.totalorder %s359_s19, %s517_s0 }
   0x6   :  { %p365_p2 = pnand %p363_p1, %p360_p0 }
   0x8   :  { %368 = shalt.err (!%p365_p2)
}
   0x9   :  { %s369_s24 = scalar_lea.vmem %s20_s16, 256  ;;  %p374_p4 = scmp.lt.s32.totalorder %s20_s16, %s20_s16 }
   0xa   :  { %p370_p3 = scmp.ne.s32.totalorder %s20_s16, %s369_s24  ;;  %p375_p5 = scmp.lt.s32.totalorder %s369_s24, %s369_s24 }
   0xc   :  { %p376_p6 = por %p375_p5, %p374_p4 }
   0xe   :  { %p377_p7 = pnand %p376_p6, %p370_p3 }
  0x10   :  { %380 = shalt.err (!%p377_p7)
}
  0x11   :  { %s432_s25 = smov 128   ;;  %s433_s26 = smov 8  }
  0x12   :  { %25 = dma.hbm_to_vmem [thread:$0]  %s517_s0, 256, %s20_s16, [#allocation4], %s432_s25, %s432_s25, %s433_s26  }
  0x13   :  { %425 = dma.done.wait [#allocation4], 256  }
  0x14   :  { %426 = vsyncadd [#allocation4], 4294967040  ;;  %v476_v0 = vld [vmem:[#allocation3] sm:$0xff]  ;;  %vm45_vm0 = vcmask 261120   ;;  %v34_v2 = vld [vmem:[#allocation3 + $0x8] sm:$0xff]  ;;  %v57_v7 = vlaneseq  ;;  %v52_v10 = vstv %s519_s2  ;;  %vm67_vm1 = vcmask 1041409  }
  0x15   :  { %v326_v1 = vld [vmem:[%s518_s1] ss:$0 sm:$0xff]  ;;  %vm70_vm2 = vcmask 58368   ;;  %v434_v20 = vmov 0   ;;  %v435_v43 = vmov 0.0   ;;  %vm436_vm3 = vmmov 0  }
  0x16   :  { %v43_v3 = vmul.f32 %v326_v1, %v476_v0  ;;  %v44_v4 = vmul.f32 %v326_v1, %v34_v2  ;;  %v58_v8 = vand.u32 127, %v57_v7  ;;  %v60_v9 = vshrl.u32 %v57_v7, 7  ;;  %352 = vset.pattern.permute.xlu0 %v434_v20  ;;  %351 = vset.pattern.permute.xlu1 %v434_v20  ;;  %s437_s1 = smov [#allocation7]  }
  0x17   :  { %338 = vmatprep.subr.mxu1 %v435_v43  ;;  %340 = vmatprep.mubr.msk.f32.mxu1 %vm436_vm3, %v435_v43  ;;  %vm145_vm4 = vcmask 64512   ;;  %s313_s2 = sshll.u32 %s437_s1, 4  ;;  %s314_s2 = int_to_ptr.vmem [resolvable:$true] %s313_s2 }
  0x18   :  { %v46_v5 = vsel %vm45_vm0, %v43_v3, 0.0  ;;  %v49_v6 = vsel %vm45_vm0, %v44_v4, 0.0  ;;  %v61_v12 = vsub.s32 %v58_v8, %v60_v9  ;;  %v77_v21 = vsub.s32 0, %v60_v9  ;;  %339 = vmatpush3.msra.mxu1 %v34_v2  ;;  %333 = vmatprep.subr.mxu0 %v435_v43  ;;  %s381_s6 = scalar_lea.vmem %s314_s2, 32  ;;  %p386_p9 = scmp.lt.s32.totalorder %s314_s2, %s314_s2 }
  0x19   :  { %47 = vadd.xlane.f32.xlu0 %v46_v5  ;;  %v81_v22 = vsub.s32 1, %v60_v9  ;;  %335 = vmatprep.mubr.msk.f32.mxu0 %vm436_vm3, %v435_v43  ;;  %p382_p8 = scmp.ne.s32.totalorder %s314_s2, %s381_s6  ;;  %p387_p10 = scmp.lt.s32.totalorder %s381_s6, %s381_s6 }
  0x1a   :  { %334 = vmatpush3.msra.mxu0 %v476_v0 }
  0x1b   :  { %p388_p11 = por %p387_p10, %p386_p9 }
  0x1d   :  { %50 = vadd.xlane.f32.xlu0 %v49_v6  ;;  %p389_p12 = pnand %p388_p11, %p382_p8 }
  0xa6   :  { %v48_v11 = vpop.xlane.xlu0 %47 }
  0xa7   :  { %v53_v13 = vadd.f32 %v52_v10, %v48_v11 }
  0xa9   :  { %v62_v16 = vrot.slane %v53_v13, %v61_v12 }
  0xaa   :  { %v51_v14 = vpop.xlane.xlu0 %50 }
  0xab   :  { %v54_v15 = vadd.f32 %v52_v10, %v51_v14 }
  0xad   :  { %v66_v17 = vrot.slane %v54_v15, %v61_v12 }
  0xaf   :  { %v68_v18 = vsel %vm67_vm1, %v66_v17, %v62_v16 }
  0xb0   :  { %v71_v19 = vsel %vm70_vm2, %v68_v18, -inf }
  0xb1   :  { %72 = vmax.xlane.f32.xlu1 %v71_v19 }
 0x13e   :  { %v73_v23 = vpop.xlane.xlu1 %72 }
 0x13f   :  { %v78_v24 = vrot.slane %v73_v23, %v77_v21  ;;  %v82_v25 = vrot.slane %v73_v23, %v81_v22 }
 0x141   :  { %v85_v26 = vsub.f32 %v53_v13, %v78_v24  ;;  %v86_v27 = vsub.f32 %v54_v15, %v82_v25 }
 0x143   :  { %v87_v28 = vmul.f32 1.442695, %v85_v26  ;;  %v89_v29 = vmul.f32 1.442695, %v86_v27 }
 0x145   :  { %353 = vpow2.f32 %v87_v28 }
 0x146   :  { %355 = vpow2.f32 %v89_v29 }
 0x14f   :  { %v354_v30 = vpop.eup %353 }
 0x150   :  { %v356_v31 = vpop.eup %355  ;;  %94 = vperm.xlu1 %351, %v354_v30  }
 0x151   :  { %97 = vperm.xlu0 %352, %v356_v31  }
 0x1cf   :  { %v95_v32 = vpop.permute.xlu1 %94 }
 0x1d0   :  { %v98_v33 = vpop.permute.xlu0 %97  ;;  %v102_v34 = vrot.slane %v95_v32, %v61_v12 }
 0x1d1   :  { %v106_v35 = vrot.slane %v98_v33, %v61_v12 }
 0x1d3   :  { %v107_v36 = vsel %vm67_vm1, %v106_v35, %v102_v34 }
 0x1d4   :  { %v109_v37 = vsel %vm70_vm2, %v107_v36, 0.0 }
 0x1d5   :  { %110 = vadd.xlane.f32.xlu1 %v109_v37 }
 0x262   :  { %v111_v38 = vpop.xlane.xlu1 %110 }
 0x263   :  { %357 = vrcp.f32 %v111_v38 }
 0x26d   :  { %v358_v39 = vpop.eup %357 }
 0x26e   :  { %v121_v40 = vrot.slane %v358_v39, %v81_v22  ;;  %v117_v42 = vrot.slane %v358_v39, %v77_v21 }
 0x270   :  { %v125_v41 = vmul.f32 %v356_v31, %v121_v40  ;;  %v124_v44 = vmul.f32 %v354_v30, %v117_v42 }
 0x272   :  { %132 = vperm.xlu0 %352, %v125_v41  }
 0x276   :  { %129 = vperm.xlu0 %352, %v124_v44  }
 0x2f1   :  { %v133_v45 = vpop.permute.xlu0 %132 }
 0x2f2   :  { %v141_v46 = vrot.slane %v133_v45, %v61_v12 }
 0x2f4   :  { %341 = vmatmul.mubr.msk.f32.vlgmr.msra.gmra.mrb[0].mxu1 %vm145_vm4, %v141_v46 }
 0x2f5   :  { %v130_v47 = vpop.permute.xlu0 %129 }
 0x2f6   :  { %v137_v48 = vrot.slane %v130_v47, %v61_v12 }
 0x2f8   :  { %336 = vmatmul.mubr.msk.f32.vlgmr.msra.gmra.mrb[0].mxu0 %vm145_vm4, %v137_v48  ;;  %v142_v49 = vsel %vm67_vm1, %v141_v46, %v137_v48 }
 0x2f9   :  { %144 = vst.msk [vmem:[#allocation7] sm:$0x3] %vm70_vm2, %v142_v49 }
 0x2fa   :  { %392 = shalt.err (!%p389_p12)
}
 0x2fb   :  { %s393_s9 = scalar_lea.hbm %s521_s4, 32 }
 0x2fc   :  { %p394_p13 = scmp.ne.s32.totalorder %s521_s4, %s393_s9  ;;  %p397_p0 = scmp.lt.u32.totalorder %s393_s9, %s521_s4 }
 0x2fe   :  { %p399_p1 = pnand %p397_p0, %p394_p13 }
 0x300   :  { %402 = shalt.err (!%p399_p1)
}
 0x301   :  { %316 = dma.vmem_to_hbm [thread:$0]  %s314_s2, 32, %s521_s4, [#allocation8]   ;;  %vm295_vm5 = vcmask 254976  }
 0x302   :  { %s438_s16 = smov [#allocation6]  }
 0x303   :  { %s303_s17 = sshll.u32 %s438_s16, 4  ;;  %s304_s17 = int_to_ptr.vmem [resolvable:$true] %s303_s17 }
 0x304   :  { %s403_s18 = scalar_lea.vmem %s304_s17, 32  ;;  %p408_p3 = scmp.lt.s32.totalorder %s304_s17, %s304_s17 }
 0x305   :  { %p404_p2 = scmp.ne.s32.totalorder %s304_s17, %s403_s18  ;;  %p409_p4 = scmp.lt.s32.totalorder %s403_s18, %s403_s18 }
 0x307   :  { %p410_p5 = por %p409_p4, %p408_p3 }
 0x309   :  { %p411_p6 = pnand %p410_p5, %p404_p2 }
 0x3c7   :  { %v286_v50 = vpop.f32.mrb[0].mxu1 }
 0x3c8   :  { %v342_v51 = vpop.f32.mrb[1].mxu1  ;;  %v292_v52 = vrot.slane %v286_v50, 7 }
 0x3cb   :  { %v214_v53 = vpop.f32.mrb[0].mxu0 }
 0x3cc   :  { %v293_v54 = vsel %vm67_vm1, %v292_v52, %v214_v53  ;;  %v337_v55 = vpop.f32.mrb[1].mxu0 }
 0x3cd   :  { %296 = vst.msk [vmem:[#allocation6] sm:$0x3] %vm295_vm5, %v293_v54 }
 0x3ce   :  { %414 = shalt.err (!%p411_p6)
}
 0x3cf   :  { %s415_s20 = scalar_lea.hbm %s520_s3, 32 }
 0x3d0   :  { %p416_p7 = scmp.ne.s32.totalorder %s520_s3, %s415_s20  ;;  %p419_p8 = scmp.lt.u32.totalorder %s415_s20, %s520_s3 }
 0x3d2   :  { %p421_p9 = pnand %p419_p8, %p416_p7 }
 0x3d4   :  { %424 = shalt.err (!%p421_p9)
}
 0x3d5   :  { %306 = dma.vmem_to_hbm [thread:$0]  %s304_s17, 32, %s520_s3, [#allocation5]  }
 0x3d6   :  { %427 = dma.done.wait [#allocation5], 32  }
 0x3d7   :  { %428 = vsyncadd [#allocation5], 4294967264 }
 0x3d8   :  { %429 = dma.done.wait [#allocation8], 32  }
 0x3d9   :  { %430 = vsyncadd [#allocation8], 4294967264 }
 0x3da   :  { %323 = vsyncpa [#allocation4], 1 }
 0x3db   :  { %324 = vsyncpa [#allocation5], 1 }
 0x3dc   :  { %325 = vsyncpa [#allocation8], 1 }

</bundles_post_ra>
